<compile_context>
chip_gen: v7x
topology: tpu7x:2x2x1
jax: 0.10.0
libtpu: 0.0.40
codegen_flags: <defaults>
</compile_context>

<pallas_src>
from functools import partial

import jax
import jax.numpy as jnp
from jax.experimental import pallas as pl
from jax.experimental.pallas import tpu as pltpu


def _round_up(v: int, m: int) -> int:
    return ((v + m - 1) // m) * m


def _residual_linear_kernel(x_ref, w_ref, b_ref, o_ref):
    """o = (x @ W + b) + x   -- fused fn(x) + residual, f32 accumulate."""
    x = x_ref[...]
    y = jnp.dot(x, w_ref[...], preferred_element_type=jnp.float32)
    y = y + b_ref[...]                            # (1, Hp) broadcasts over rows
    o_ref[...] = (y + x.astype(jnp.float32)).astype(o_ref.dtype)


@partial(jax.jit, static_argnames=("tm",))
def residual_forward(x, w, b, *, tm: int = 256):
    """x: [B, S, H], w: [H, H], b: [H]  ->  fn(x) + x, shape [B, S, H]."""
    B, S, H = x.shape
    N = B * S

    # Lane dim padded to a multiple of 128; row tile a multiple of 8.
    H_pad = _round_up(H, 128)
    tm = min(tm, _round_up(N, 8))
    N_pad = _round_up(N, tm)

    x2d = jnp.pad(x.reshape(N, H), ((0, N_pad - N), (0, H_pad - H)))
    w_pad = jnp.pad(w, ((0, H_pad - H), (0, H_pad - H)))   # zero-filled pad cols
    b_pad = jnp.pad(b, (0, H_pad - H)).reshape(1, H_pad)

    grid = (pl.cdiv(N_pad, tm),)
    itemsize = jnp.dtype(x.dtype).itemsize

    # VMEM budget: resident W + bias + double-buffered (tm, H_pad) x and out.
    need = (H_pad * H_pad + H_pad + 4 * tm * H_pad) * itemsize
    vmem_limit_bytes = int(min(max(2 * need, 16 * 1024 * 1024),
                               48 * 1024 * 1024))

    cost = pl.CostEstimate(
        flops=2 * N_pad * H_pad * H_pad,
        transcendentals=0,
        bytes_accessed=(2 * N_pad * H_pad + H_pad * H_pad + H_pad) * itemsize,
    )

    out2d = pl.pallas_call(
        _residual_linear_kernel,
        out_shape=jax.ShapeDtypeStruct((N_pad, H_pad), x.dtype),
        grid=grid,
        in_specs=[
            pl.BlockSpec((tm, H_pad), lambda i: (i, 0)),      # x tile
            pl.BlockSpec((H_pad, H_pad), lambda i: (0, 0)),   # W resident
            pl.BlockSpec((1, H_pad), lambda i: (0, 0)),       # bias resident
        ],
        out_specs=pl.BlockSpec((tm, H_pad), lambda i: (i, 0)),
        compiler_params=pltpu.CompilerParams(
            dimension_semantics=("parallel",),
            vmem_limit_bytes=vmem_limit_bytes,
        ),
        cost_estimate=cost,
        input_output_aliases={0: 0},   # out reuses the padded-x intermediate
    )(x2d, w_pad, b_pad)

    # TODO(synk): for very large H (>= ~2048) on v7x, additionally column-tile
    # W (grid=(M_tiles, N_tiles)) instead of keeping the full W resident.
    return out2d[:N, :H].reshape(B, S, H)


def residual_reference(x, w, b):
    """Pure-JAX reference:  fn(x) + x  with fn = Linear(H, H)."""
    return jnp.einsum("bsh,hk->bsk", x, w) + b + x


if __name__ == "__main__":
    # Small Transformer-ish shapes: batch=2, seq=8, hidden=32.
    B, S, H = 2, 8, 32
    key = jax.random.PRNGKey(0)
    kx, kw, kb = jax.random.split(key, 3)

    x = jax.random.normal(kx, (B, S, H), dtype=jnp.float32)
    # Deterministic parameter init for the wrapped fn (synthetic Linear).
    w = jax.random.normal(kw, (H, H), dtype=jnp.float32) * (1.0 / jnp.sqrt(H))
    b = jax.random.normal(kb, (H,), dtype=jnp.float32) * 0.02

    # tm=8 exercises the multi-tile (pipelined) path even at this tiny size;
    # real transformer shapes use the default tm=256.
    out = residual_forward(x, w, b, tm=8)
    out = jax.block_until_ready(out)

    ref = residual_reference(x, w, b)
    assert out.shape == (B, S, H)
    assert jnp.allclose(out, ref, atol=1e-5, rtol=1e-5), "mismatch vs reference"

    # TODO(synk): the `weights=True` branch returns (output, weights) from fn;
    # since fn is external to the module, only the residual-add semantics are
    # kernelized here.
    print("KERNEL_OK")
</pallas_src>

<mosaic_0001>
module attributes {stable_mosaic.version = 11 : i64} {
  func.func @_residual_linear_kernel(%arg0: i32, %arg1: memref<8x128xf32, #tpu.memory_space<vmem>>, %arg2: memref<128x128xf32, #tpu.memory_space<vmem>>, %arg3: memref<1x128xf32, #tpu.memory_space<vmem>>, %arg4: memref<8x128xf32, #tpu.memory_space<vmem>>) attributes {dimension_semantics = [#tpu.dimension_semantics<parallel>], iteration_bounds = array<i64: 2>, scalar_prefetch = 0 : i64, scratch_operands = 0 : i64, tpu.core_type = #tpu.core_type<tc>, window_params = [{transform_indices = @transform_0, window_bounds = array<i64: 8, 128>}, {pipeline_mode = #tpu.pipeline_mode<synchronous>, transform_indices = @transform_1, window_bounds = array<i64: 128, 128>}, {pipeline_mode = #tpu.pipeline_mode<synchronous>, transform_indices = @transform_2, window_bounds = array<i64: 1, 128>}, {transform_indices = @transform_3, window_bounds = array<i64: 8, 128>}]} {
    %c0 = arith.constant 0 : index
    %c0_0 = arith.constant 0 : index
    %0 = vector.load %arg1[%c0, %c0_0] : memref<8x128xf32, #tpu.memory_space<vmem>>, vector<8x128xf32>
    %c0_1 = arith.constant 0 : index
    %c0_2 = arith.constant 0 : index
    %1 = vector.load %arg2[%c0_1, %c0_2] : memref<128x128xf32, #tpu.memory_space<vmem>>, vector<128x128xf32>
    %cst = arith.constant dense<0.000000e+00> : vector<8x128xf32>
    %2 = tpu.matmul %0, %1, %cst {dimension_numbers = #tpu.dot_dimension_numbers<[1], [0], [0], [1], [0, 0, 1, 1], [], []>} : vector<8x128xf32>, vector<128x128xf32>, vector<8x128xf32> -> vector<8x128xf32>
    %c0_3 = arith.constant 0 : index
    %c0_4 = arith.constant 0 : index
    %3 = vector.load %arg3[%c0_3, %c0_4] : memref<1x128xf32, #tpu.memory_space<vmem>>, vector<1x128xf32>
    %4 = vector.broadcast %3 : vector<1x128xf32> to vector<8x128xf32>
    %5 = arith.addf %2, %4 : vector<8x128xf32>
    %6 = arith.addf %5, %0 : vector<8x128xf32>
    %c0_5 = arith.constant 0 : index
    %c0_6 = arith.constant 0 : index
    %7 = vector.load %arg4[%c0_5, %c0_6] : memref<8x128xf32, #tpu.memory_space<vmem>>, vector<8x128xf32>
    tpu.vector_store %arg4[%c0_5, %c0_6], %6 {strides = array<i32>} : memref<8x128xf32, #tpu.memory_space<vmem>>, vector<8x128xf32>,
    return
  }
  func.func @transform_0(%arg0: i32) -> (i32, i32) {
    %c0_i32 = arith.constant 0 : i32
    %c0_i32_0 = arith.constant 0 : i32
    return %arg0, %c0_i32 : i32, i32
  }
  func.func @transform_1(%arg0: i32) -> (i32, i32) {
    %c0_i32 = arith.constant 0 : i32
    %c0_i32_0 = arith.constant 0 : i32
    %c0_i32_1 = arith.constant 0 : i32
    return %c0_i32, %c0_i32_0 : i32, i32
  }
  func.func @transform_2(%arg0: i32) -> (i32, i32) {
    %c0_i32 = arith.constant 0 : i32
    %c0_i32_0 = arith.constant 0 : i32
    %c0_i32_1 = arith.constant 0 : i32
    return %c0_i32, %c0_i32_0 : i32, i32
  }
  func.func @transform_3(%arg0: i32) -> (i32, i32) {
    %c0_i32 = arith.constant 0 : i32
    %c0_i32_0 = arith.constant 0 : i32
    return %arg0, %c0_i32 : i32, i32
  }
}

</mosaic_0001>

<bundles_post_ra>
// kernel: residual_forward.1
= control target key start
LH: loop header
LB: loop body
LE: loop exit
PB: predicated region body
PF: predicated region fallthrough
CT: control target
= control target key end

     0   :  { %s443_s12 = smov 0   ;;  %s515_s0 = inlined_call_operand.vmem [shape: f32[16,128], index: 0, kind: input, shape index: {}, may-alias: {0,3}]   ;;  %s516_s1 = inlined_call_operand.vmem [shape: f32[128,128], index: 1, kind: input, shape index: {}]   ;;  %s517_s2 = inlined_call_operand.vmem [shape: f32[1,128], index: 2, kind: input, shape index: {}]   ;;  %s518_s3 = inlined_call_operand.vmem [shape: f32[16,128], index: 3, kind: output, shape index: {}, may-alias: {0,3}]  }
   0x1 LB: > { %s315_s13 = sadd.s32 4294967295, %s418_s12   ;;  %p319_p0 = scmp.ge.s32.totalorder %s418_s12, 1  ;;  %s418_s12 = sphi %s443_s12, %s13_s12  }
   0x2   : > { %p136_p1 = scmp.lt.s32.totalorder %s418_s12, 3 }
   0x4   : > { %p137_p2 = pnand %p319_p0, %p136_p1 }
   0x5   : > { %v167_v0 = vld [vmem:[%s516_s1] sm:$0xff] (!%p137_p2)  ;;  %v168_v1 = vld [vmem:[%s516_s1 + $0x8] sm:$0xff] (!%p137_p2)  ;;  %v169_v2 = vld [vmem:[%s516_s1 + $0x10] sm:$0xff] (!%p137_p2)  ;;  %v420_v3 = vmov (!%p137_p2), 0.0|0.0   ;;  %vm421_vm0 = vmmov (!%p137_p2), 0   ;;  %v422_v6 = vmov (!%p137_p2), 0.0  }
   0x6   : > { %140 = sbr.rel (%p137_p2) target bundleno = 256 (0x100), region = 32  ;;  %377 = vmatprep.subr.bf16.mxu0 (!%p137_p2), %v420_v3  ;;  %v378_v4 = vpack.c.bf16 (!%p137_p2), %v168_v1, %v167_v0  ;;  %v170_v5 = vld [vmem:[%s516_s1 + $0x18] sm:$0xff] (!%p137_p2)  ;;  %374 = vmatprep.mubr.msk.f32.mxu0 (!%p137_p2), %vm421_vm0, %v422_v6  ;;  %v171_v8 = vld [vmem:[%s516_s1 + $0x20] sm:$0xff] (!%p137_p2)  ;;  %v172_v9 = vld [vmem:[%s516_s1 + $0x28] sm:$0xff] (!%p137_p2)  ;;  %p158_p3 = scmp.lt.s32.totalorder (!%p137_p2), %s315_s13, 1 }
   0x7   : > { %v381_v7 = vpack.c.bf16 (!%p137_p2), %v170_v5, %v169_v2  ;;  %v384_v10 = vpack.c.bf16 (!%p137_p2), %v172_v9, %v171_v8  ;;  %v173_v11 = vld [vmem:[%s516_s1 + $0x30] sm:$0xff] (!%p137_p2)  ;;  %v174_v12 = vld [vmem:[%s516_s1 + $0x38] sm:$0xff] (!%p137_p2)  ;;  %v175_v14 = vld [vmem:[%s516_s1 + $0x40] sm:$0xff] (!%p137_p2) }
   0x8   : > { %379 = vmatpush3.bf16.msra.mxu0 (!%p137_p2), %v378_v4  ;;  %v387_v13 = vpack.c.bf16 (!%p137_p2), %v174_v12, %v173_v11  ;;  %v176_v15 = vld [vmem:[%s516_s1 + $0x48] sm:$0xff] (!%p137_p2)  ;;  %v177_v17 = vld [vmem:[%s516_s1 + $0x50] sm:$0xff] (!%p137_p2)  ;;  %v178_v18 = vld [vmem:[%s516_s1 + $0x58] sm:$0xff] (!%p137_p2) }
   0x9   : > { %380 = vmatprep.subr.bf16.mxu0 (!%p137_p2), %v420_v3  ;;  %v390_v16 = vpack.c.bf16 (!%p137_p2), %v176_v15, %v175_v14  ;;  %v393_v19 = vpack.c.bf16 (!%p137_p2), %v178_v18, %v177_v17  ;;  %v179_v20 = vld [vmem:[%s516_s1 + $0x60] sm:$0xff] (!%p137_p2)  ;;  %v180_v21 = vld [vmem:[%s516_s1 + $0x68] sm:$0xff] (!%p137_p2)  ;;  %v181_v23 = vld [vmem:[%s516_s1 + $0x70] sm:$0xff] (!%p137_p2) }
   0xa   : > { %v396_v22 = vpack.c.bf16 (!%p137_p2), %v180_v21, %v179_v20  ;;  %v182_v24 = vld [vmem:[%s516_s1 + $0x78] sm:$0xff] (!%p137_p2)  ;;  %v322_v27 = vld [vmem:[%s517_s2] ss:$0 sm:$0xff] (!%p137_p2) }
   0xb   : > { %v399_v25 = vpack.c.bf16 (!%p137_p2), %v182_v24, %v181_v23 }
   0xc   : > { %382 = vmatpush3.bf16.msra.mxu0 (!%p137_p2), %v381_v7 }
   0xd   : > { %383 = vmatprep.subr.bf16.mxu0 %v420_v3  ;;  %s520_s13 = smov (!%p158_p3, %s315_s13), 1 }
   0xe   : > { %s320_s21 = sshll.u32 %s520_s13, 3 }
   0xf   : > { %s161_s24 = scalar_lea.vmem %s515_s0, %s320_s21  ;;  %s165_s13 = scalar_lea.vmem %s518_s3, %s320_s21 }
  0x10   : > { %385 = vmatpush3.bf16.msra.mxu0 %v384_v10  ;;  %v166_v26 = vld [vmem:[%s161_s24] sm:$0xff] }
  0x11   : > { %386 = vmatprep.subr.bf16.mxu0 %v420_v3 }
  0x14   : > { %388 = vmatpush3.bf16.msra.mxu0 %v387_v13 }
  0x15   : > { %389 = vmatprep.subr.bf16.mxu0 %v420_v3 }
  0x18   : > { %391 = vmatpush3.bf16.msra.mxu0 %v390_v16 }
  0x19   : > { %392 = vmatprep.subr.bf16.mxu0 %v420_v3 }
  0x1c   : > { %394 = vmatpush3.bf16.msra.mxu0 %v393_v19 }
  0x1d   : > { %395 = vmatprep.subr.bf16.mxu0 %v420_v3 }
  0x20   : > { %397 = vmatpush3.bf16.msra.mxu0 %v396_v22 }
  0x21   : > { %398 = vmatprep.subr.bf16.mxu0 %v420_v3 }
  0x24   : > { %400 = vmatpush3.bf16.msra.mxu0 %v399_v25 }
  0x27   : > { %375 = vmatmul.mubr.f32.vlgmr.msra.gmra.mrb[0].mxu0 %v166_v26 }
  0xfa   : > { %v256_v28 = vpop.f32.mrb[0].mxu0 }
  0xfb   : > { %v257_v29 = vadd.f32 %v322_v27, %v256_v28  ;;  %v376_v30 = vpop.f32.mrb[1].mxu0 }
  0xfd   : > { %v260_v31 = vadd.f32 %v257_v29, %v166_v26 }
  0xff   : > { %261 = vst [vmem:[%s165_s13] sm:$0xff] %v260_v31 }
 0x100 PF: > { %s13_s12 = sadd.s32 1, %s418_s12  }
 0x101   : > { %p10_p4 = scmp.ge.s32.totalorder %s13_s12, 4  }
 0x103   :  { %12 = sbr.rel (!%p10_p4) target bundleno = 1 (0x1), region = 62 }

</bundles_post_ra>
